<compile_context>
chip_gen: v6e
topology: v6e:2x2x1
jax: 0.10.0
libtpu: 0.0.40
codegen_flags: <defaults>
</compile_context>

<pallas_src>
import functools

import jax
import jax.numpy as jnp
from jax.experimental import pallas as pl
from jax.experimental.pallas import tpu as pltpu


_MM_DTYPE = jnp.bfloat16            # matmul operands + stored activation slabs
_LANE = 128                         # conv-output channels padded to lane width
_SUBLANE = 8
_ACT_VMEM_BUDGET = 24 * 1024 * 1024  # in+out activation double-buffers per grid step
_VMEM_LIMIT = 48 * 1024 * 1024       # <= v7x's 64 MiB physical per-TC VMEM


def _round_up(x, m):
    return ((x + m - 1) // m) * m


def _choose_tm(m, tm_budget):
    """Largest centroid tile (multiple of 8) within the VMEM budget; prefer a
    divisor of m so no padded centroid groups exist at all."""
    m_al = _round_up(m, _SUBLANE)
    budget = max(_SUBLANE, min(tm_budget, m_al))
    budget -= budget % _SUBLANE
    if m % _SUBLANE == 0:
        t, tries = budget, 0
        while t >= _SUBLANE and tries < 4096:
            if m % t == 0:
                return t
            t -= _SUBLANE
            tries += 1
    return budget


# ---------------------------------------------------------------------------
# Plain-JAX glue (sampling / grouping: data-dependent gathers, not the
# matmul/reduction hot path)
# ---------------------------------------------------------------------------

def square_distance(src, dst):
    # ||src||^2 + ||dst||^2 - 2 src.dst^T  (MXU form, no (B,N,M,C) broadcast)
    s2 = jnp.sum(src * src, axis=-1)[:, :, None]            # [B,N,1]
    d2 = jnp.sum(dst * dst, axis=-1)[:, None, :]             # [B,1,M]
    cross = jnp.einsum('bnc,bmc->bnm', src, dst)
    return jnp.maximum(s2 + d2 - 2.0 * cross, 0.0)


def index_points(points, idx):
    # points: [B, N, C], idx: [B, ...] -> [B, ..., C]
    return jax.vmap(lambda p, i: p[i])(points, idx)


def farthest_point_sample(xyz, npoint):
    # TODO(synk): PyTorch seeds FPS with torch.randint; we use point 0
    # deterministically (same algorithm otherwise).
    B, N, _ = xyz.shape

    def body(i, state):
        centroids, distance, farthest = state
        centroids = centroids.at[:, i].set(farthest)
        centroid = jax.vmap(lambda p, f: p[f])(xyz, farthest)[:, None, :]   # [B,1,C]
        dist = jnp.sum((xyz - centroid) ** 2, axis=-1)                      # [B,N]
        distance = jnp.minimum(distance, dist)
        farthest = jnp.argmax(distance, axis=-1).astype(jnp.int32)
        return centroids, distance, farthest

    centroids = jnp.zeros((B, npoint), jnp.int32)
    distance = jnp.full((B, N), 1e10, jnp.float32)
    farthest = jnp.zeros((B,), jnp.int32)
    centroids, _, _ = jax.lax.fori_loop(0, npoint, body,
                                        (centroids, distance, farthest))
    return centroids


def query_ball_point(radius, nsample, xyz, new_xyz):
    B, N, _ = xyz.shape
    S = new_xyz.shape[1]
    sqrdists = square_distance(new_xyz, xyz)                                # [B,S,N]
    idx = jnp.broadcast_to(jnp.arange(N, dtype=jnp.int32), (B, S, N))
    idx = jnp.where(sqrdists > radius ** 2, N, idx)
    # nsample smallest indices (ascending): partial selection instead of a
    # full O(N log N) sort over N.
    neg_topk, _ = jax.lax.top_k(-idx, nsample)
    group_idx = -neg_topk                                                    # [B,S,K]
    group_first = jnp.broadcast_to(group_idx[:, :, 0:1], group_idx.shape)
    group_idx = jnp.where(group_idx == N, group_first, group_idx)
    return group_idx


def sample_and_group(npoint, radius, nsample, xyz, points):
    fps_idx = farthest_point_sample(xyz, npoint)                            # [B,S]
    new_xyz = index_points(xyz, fps_idx)                                    # [B,S,C]
    idx = query_ball_point(radius, nsample, xyz, new_xyz)                   # [B,S,K]
    grouped_xyz = index_points(xyz, idx)                                    # [B,S,K,C]
    grouped_xyz_norm = grouped_xyz - new_xyz[:, :, None, :]
    if points is not None:
        grouped_points = index_points(points, idx)                          # [B,S,K,D]
        new_points = jnp.concatenate([grouped_xyz_norm, grouped_points], axis=-1)
    else:
        new_points = grouped_xyz_norm
    return new_xyz, new_points


def sample_and_group_all(xyz, points):
    B, N, C = xyz.shape
    new_xyz = jnp.zeros((B, 1, C), xyz.dtype)
    grouped_xyz = xyz[:, None, :, :]
    if points is not None:
        new_points = jnp.concatenate([grouped_xyz, points[:, None, :, :]], axis=-1)
    else:
        new_points = grouped_xyz
    return new_xyz, new_points


# ---------------------------------------------------------------------------
# Pallas kernel: one fused MLP layer per call, tiled over M = B*npoint
# ---------------------------------------------------------------------------

def _layer_kernel(apply_act, is_last, tm, nsample, *refs):
    """One MLP layer over one row tile (tm centroids x nsample rows).

      [BN-affine + ReLU of the previous layer's pre-BN slab]     (layers > 0)
      -> 1x1-conv-as-matmul on the MXU (bf16 operands, f32 accumulate)
      -> per-tile partial sum / sum-of-squares of h for THIS layer's
         training-mode BatchNorm, via ones-row MXU matmuls (VALU-free)
      -> last layer only: per-centroid pre-BN max/min of h over nsample
         (the monotone BN-affine + ReLU + max finalization is plain JAX).
    """
    if apply_act:
        ss_ref, a_ref, w_ref = refs[0], refs[1], refs[2]
        out_refs = refs[3:]
        a = a_ref[...].astype(jnp.float32)                       # (br, c_in)
        a = jnp.maximum(a * ss_ref[0:1, :] + ss_ref[1:2, :], 0.0)
        a_mm = a.astype(_MM_DTYPE)
    else:
        a_ref, w_ref = refs[0], refs[1]
        out_refs = refs[2:]
        a_mm = a_ref[...]                                        # already bf16

    h = jnp.dot(a_mm, w_ref[...], preferred_element_type=jnp.float32)   # (br, c_out)
    br, c_out = h.shape

    # Partial BN statistics: row 0 = sum(h), row 1 = sum(h*h) over this tile.
    # Reduce via ones-row matmuls on the MXU so the VPU stays free.
    ones_row = jnp.ones((1, br), jnp.float32)
    s = jnp.dot(ones_row, h, preferred_element_type=jnp.float32)        # (1, c_out)
    sq = jnp.dot(ones_row, h * h, preferred_element_type=jnp.float32)   # (1, c_out)
    row_id = jax.lax.broadcasted_iota(jnp.int32, (_SUBLANE, c_out), 0)
    out_refs[-1][...] = jnp.where(row_id == 0, s,
                                  jnp.where(row_id == 1, sq, 0.0))      # (8, c_out)

    if is_last:
        h3 = h.reshape(tm, nsample, c_out)            # nsample on the sublane axis
        out_refs[0][...] = jnp.max(h3, axis=1)        # (tm, c_out)
        out_refs[1][...] = jnp.min(h3, axis=1)        # (tm, c_out)
    else:
        out_refs[0][...] = h.astype(out_refs[0].dtype)


def _fused_mlp_max(x, layers, eps):
    """x: (M, K, C0) grouped features -> (M, C_last) f32 pooled features.

    Runs the (conv1x1 -> BatchNorm(train) -> ReLU)* chain plus the max over
    the K (nsample) axis as tiled Pallas calls.  BN training-mode stats span
    the whole M*K batch: each layer kernel emits per-tile partial sums, the
    tiny finalization (mean/var -> scale/shift, padded-row correction) runs in
    plain JAX, and the affine is fused into the next kernel, so tiling never
    changes the numerics.
    """
    M, K, C0 = x.shape
    rows_valid = M * K
    n_layers = len(layers)

    # Channel widths: layer-0 input keeps its narrow width (sublane pad only,
    # no 128-lane padding in HBM); every conv output is lane-padded to 128.
    c0 = _round_up(C0, _SUBLANE)
    c_outs = [_round_up(w.shape[1], _LANE) for (w, _, _) in layers]

    # Row tile from a VMEM budget on the widest layer (double-buffered in+out).
    max_row_bytes, cin = 0, c0
    for l, cout in enumerate(c_outs):
        out_bytes = 2 * cout if l < n_layers - 1 else (8 * cout + K - 1) // K
        max_row_bytes = max(max_row_bytes, 2 * cin + out_bytes)
        cin = cout
    tm_budget = _ACT_VMEM_BUDGET // (2 * K * max_row_bytes)
    tm = _choose_tm(M, tm_budget)
    m_pad = _round_up(M, tm)
    ntiles = m_pad // tm
    br = tm * K
    pad_rows = (m_pad - M) * K

    a = jnp.pad(x.reshape(M * K, C0),
                ((0, pad_rows), (0, c0 - C0))).astype(_MM_DTYPE)

    cparams = pltpu.CompilerParams(
        dimension_semantics=("parallel",),            # megacore sharding on v7x
        vmem_limit_bytes=_VMEM_LIMIT)

    scale_shift = None
    scale = shift = None
    hmax = hmin = None
    pad_act = jnp.zeros((c0,), jnp.float32)           # pad-row activation fed to layer 0
    c_in = c0
    for l, (w, gamma, beta) in enumerate(layers):
        c_out_true = w.shape[1]
        c_out = c_outs[l]
        w_p = jnp.pad(w, ((0, c_in - w.shape[0]),
                          (0, c_out - c_out_true))).astype(_MM_DTYPE)

        apply_act = l > 0
        is_last = l == n_layers - 1
        kernel = functools.partial(_layer_kernel, apply_act, is_last, tm, K)

        in_specs, args = [], []
        if apply_act:
            # packed per-layer affine params: row 0 = scale, row 1 = shift
            in_specs.append(pl.BlockSpec((2, c_in), lambda i: (0, 0)))
            args.append(scale_shift)
        in_specs.append(pl.BlockSpec((br, c_in), lambda i: (i, 0)))
        args.append(a)
        in_specs.append(pl.BlockSpec((c_in, c_out), lambda i: (0, 0)))
        args.append(w_p)
        # TODO(synk): weight / scale_shift blocks are grid-invariant; a
        # single-buffer pipeline_mode would save ~1-2 MiB of VMEM per call.

        stats_spec = pl.BlockSpec((_SUBLANE, c_out), lambda i: (i, 0))
        stats_shape = jax.ShapeDtypeStruct((ntiles * _SUBLANE, c_out), jnp.float32)
        if is_last:
            out_specs = [pl.BlockSpec((tm, c_out), lambda i: (i, 0)),
                         pl.BlockSpec((tm, c_out), lambda i: (i, 0)),
                         stats_spec]
            out_shape = [jax.ShapeDtypeStruct((m_pad, c_out), jnp.float32),
                         jax.ShapeDtypeStruct((m_pad, c_out), jnp.float32),
                         stats_shape]
        else:
            out_specs = [pl.BlockSpec((br, c_out), lambda i: (i, 0)), stats_spec]
            out_shape = [jax.ShapeDtypeStruct((m_pad * K, c_out), _MM_DTYPE),
                         stats_shape]

        cost = pl.CostEstimate(
            flops=int(2 * m_pad * K * c_in * c_out),
            transcendentals=0,
            bytes_accessed=int(m_pad * K * c_in * 2 + c_in * c_out * 2
                               + (m_pad * c_out * 8 if is_last
                                  else m_pad * K * c_out * 2)
                               + ntiles * _SUBLANE * c_out * 4))

        outs = pl.pallas_call(
            kernel,
            grid=(ntiles,),
            in_specs=in_specs,
            out_specs=out_specs,
            out_shape=out_shape,
            compiler_params=cparams,
            cost_estimate=cost,
        )(*args)

        if is_last:
            hmax, hmin, stats = outs
        else:
            h, stats = outs

        # ---- plain-JAX finalization of this layer's training-mode BN ----
        stats = stats.reshape(ntiles, _SUBLANE, c_out)
        total = jnp.sum(stats[:, 0, :], axis=0)
        total_sq = jnp.sum(stats[:, 1, :], axis=0)
        h_pad = None
        if pad_rows > 0:
            # Padded centroid rows all carry the same constant activation, so
            # their stat contribution is removed analytically here instead of
            # masking every element inside the kernel.
            h_pad = jnp.dot(pad_act.astype(_MM_DTYPE)[None, :], w_p,
                            preferred_element_type=jnp.float32)[0]
            total = total - pad_rows * h_pad
            total_sq = total_sq - pad_rows * (h_pad * h_pad)
        mean = total / rows_valid
        var = jnp.maximum(total_sq / rows_valid - mean * mean, 0.0)  # biased (BN train)
        # TODO(synk): E[x^2]-E[x]^2 in f32 is cancellation-prone for channels
        # with large means; a shifted two-pass finalization would be cheap.
        gamma_p = jnp.pad(gamma.reshape(-1), (0, c_out - c_out_true))
        beta_p = jnp.pad(beta.reshape(-1), (0, c_out - c_out_true))
        scale = gamma_p * jax.lax.rsqrt(var + eps)
        shift = beta_p - mean * scale
        scale_shift = jnp.stack([scale, shift], axis=0).astype(jnp.float32)

        if not is_last:
            if pad_rows > 0:
                h_pad_stored = h_pad.astype(_MM_DTYPE).astype(jnp.float32)
                pad_act = jnp.maximum(h_pad_stored * scale + shift, 0.0)
            a = h
            c_in = c_out

    # ---- fused last-layer BN-affine + ReLU + max over K (plain JAX):
    #      the affine+ReLU is monotone in h per channel, so
    #      max_K relu(s*h+b) = relu(s*max_K h + b) if s>=0 else relu(s*min_K h + b)
    c_last = layers[-1][0].shape[1]
    sc = scale[:c_last]
    sh = shift[:c_last]
    mx = hmax[:M, :c_last]
    mn = hmin[:M, :c_last]
    return jnp.where(sc[None, :] >= 0.0,
                     jnp.maximum(sc * mx + sh, 0.0),
                     jnp.maximum(sc * mn + sh, 0.0))


# ---------------------------------------------------------------------------
# Module wrapper
# ---------------------------------------------------------------------------

class PointNetSetAbstraction:
    """JAX/Pallas port of the PyTorch PointNetSetAbstraction forward pass
    (training-mode BatchNorm batch statistics).  Conv2d biases are omitted:
    the BN mean subtraction that immediately follows cancels them exactly."""

    def __init__(self, npoint, radius, nsample, in_channel, mlp, group_all, key):
        self.npoint = npoint
        self.radius = radius
        self.nsample = nsample
        self.group_all = group_all
        self.eps = 1e-5
        self.layers = []
        last = in_channel
        for out_c in mlp:
            key, kw, kg, kb = jax.random.split(key, 4)
            bound = 1.0 / (last ** 0.5)
            w = jax.random.uniform(kw, (last, out_c), jnp.float32, -bound, bound)
            gamma = 1.0 + 0.1 * jax.random.normal(kg, (1, out_c), jnp.float32)
            beta = 0.05 * jax.random.normal(kb, (1, out_c), jnp.float32)
            self.layers.append((w, gamma, beta))
            last = out_c
        self.out_channel = last
        self._forward = jax.jit(self._forward_impl)

    def _forward_impl(self, xyz, points):
        # xyz: [B, 3, N], points: [B, D, N]  (PyTorch channel-first layout)
        xyz_t = jnp.transpose(xyz, (0, 2, 1))
        points_t = jnp.transpose(points, (0, 2, 1)) if points is not None else None
        if self.group_all:
            new_xyz, new_points = sample_and_group_all(xyz_t, points_t)
        else:
            new_xyz, new_points = sample_and_group(
                self.npoint, self.radius, self.nsample, xyz_t, points_t)

        B, S, K, C0 = new_points.shape
        feats = _fused_mlp_max(
            new_points.reshape(B * S, K, C0).astype(jnp.float32),
            self.layers, self.eps)                               # (B*S, C_last)

        new_points_out = jnp.transpose(feats.reshape(B, S, self.out_channel),
                                       (0, 2, 1))                # [B, D', S]
        new_xyz_out = jnp.transpose(new_xyz, (0, 2, 1))          # [B, 3, S]
        return new_xyz_out, new_points_out

    def __call__(self, xyz, points):
        return self._forward(xyz, points)


if __name__ == "__main__":
    key = jax.random.PRNGKey(0)
    kx, kp, kparams = jax.random.split(key, 3)

    B, N, D = 2, 32, 4
    npoint, radius, nsample = 8, 0.4, 8
    mlp = [16, 32]

    xyz = jax.random.uniform(kx, (B, 3, N), dtype=jnp.float32)      # [B, C=3, N]
    points = jax.random.normal(kp, (B, D, N), dtype=jnp.float32)    # [B, D, N]

    sa = PointNetSetAbstraction(npoint, radius, nsample,
                                in_channel=D + 3, mlp=mlp,
                                group_all=False, key=kparams)
    new_xyz, new_points = sa(xyz, points)
    jax.block_until_ready((new_xyz, new_points))

    assert new_xyz.shape == (B, 3, npoint)
    assert new_points.shape == (B, mlp[-1], npoint)
    assert bool(jnp.all(jnp.isfinite(new_points)))
    print("KERNEL_OK")
</pallas_src>

<mosaic_0001>
module attributes {stable_mosaic.version = 11 : i64} {
  func.func @_layer_kernel(%arg0: i32, %arg1: memref<128x8xbf16, #tpu.memory_space<vmem>>, %arg2: memref<8x128xbf16, #tpu.memory_space<vmem>>, %arg3: memref<128x128xbf16, #tpu.memory_space<vmem>>, %arg4: memref<8x128xf32, #tpu.memory_space<vmem>>) attributes {dimension_semantics = [#tpu.dimension_semantics<parallel>], iteration_bounds = array<i64: 1>, scalar_prefetch = 0 : i64, scratch_operands = 0 : i64, tpu.core_type = #tpu.core_type<tc>, window_params = [{transform_indices = @transform_0, window_bounds = array<i64: 128, 8>}, {pipeline_mode = #tpu.pipeline_mode<synchronous>, transform_indices = @transform_1, window_bounds = array<i64: 8, 128>}, {transform_indices = @transform_2, window_bounds = array<i64: 128, 128>}, {transform_indices = @transform_3, window_bounds = array<i64: 8, 128>}]} {
    %c0 = arith.constant 0 : index
    %c0_0 = arith.constant 0 : index
    %0 = vector.load %arg1[%c0, %c0_0] : memref<128x8xbf16, #tpu.memory_space<vmem>>, vector<128x8xbf16>
    %c0_1 = arith.constant 0 : index
    %c0_2 = arith.constant 0 : index
    %1 = vector.load %arg2[%c0_1, %c0_2] : memref<8x128xbf16, #tpu.memory_space<vmem>>, vector<8x128xbf16>
    %cst = arith.constant dense<0.000000e+00> : vector<128x128xf32>
    %2 = tpu.matmul %0, %1, %cst {dimension_numbers = #tpu.dot_dimension_numbers<[1], [0], [0], [1], [0, 0, 1, 1], [], []>} : vector<128x8xbf16>, vector<8x128xbf16>, vector<128x128xf32> -> vector<128x128xf32>
    %cst_3 = arith.constant 1.000000e+00 : f32
    %3 = vector.broadcast %cst_3 : f32 to vector<1x128xf32>
    %cst_4 = arith.constant dense<0.000000e+00> : vector<1x128xf32>
    %4 = tpu.matmul %3, %2, %cst_4 {dimension_numbers = #tpu.dot_dimension_numbers<[1], [0], [0], [1], [0, 0, 1, 1], [], []>} : vector<1x128xf32>, vector<128x128xf32>, vector<1x128xf32> -> vector<1x128xf32>
    %5 = arith.mulf %2, %2 : vector<128x128xf32>
    %cst_5 = arith.constant dense<0.000000e+00> : vector<1x128xf32>
    %6 = tpu.matmul %3, %5, %cst_5 {dimension_numbers = #tpu.dot_dimension_numbers<[1], [0], [0], [1], [0, 0, 1, 1], [], []>} : vector<1x128xf32>, vector<128x128xf32>, vector<1x128xf32> -> vector<1x128xf32>
    %7 = tpu.iota {dimensions = array<i32: 0>} : vector<8x128xi32>
    %c0_i32 = arith.constant 0 : i32
    %8 = vector.broadcast %c0_i32 : i32 to vector<8x128xi32>
    %9 = arith.cmpi eq, %7, %8 : vector<8x128xi32>
    %c1_i32 = arith.constant 1 : i32
    %10 = vector.broadcast %c1_i32 : i32 to vector<8x128xi32>
    %11 = arith.cmpi eq, %7, %10 : vector<8x128xi32>
    %cst_6 = arith.constant 0.000000e+00 : f32
    %12 = vector.shape_cast %6 : vector<1x128xf32> to vector<1x128xf32>
    %13 = vector.broadcast %12 : vector<1x128xf32> to vector<8x128xf32>
    %14 = vector.broadcast %cst_6 : f32 to vector<8x128xf32>
    %15 = arith.select %11, %13, %14 : vector<8x128xi1>, vector<8x128xf32>
    %16 = vector.shape_cast %4 : vector<1x128xf32> to vector<1x128xf32>
    %17 = vector.broadcast %16 : vector<1x128xf32> to vector<8x128xf32>
    %18 = arith.select %9, %17, %15 : vector<8x128xi1>, vector<8x128xf32>
    %c0_7 = arith.constant 0 : index
    %c0_8 = arith.constant 0 : index
    %19 = vector.load %arg4[%c0_7, %c0_8] : memref<8x128xf32, #tpu.memory_space<vmem>>, vector<8x128xf32>
    tpu.vector_store %arg4[%c0_7, %c0_8], %18 {strides = array<i32>} : memref<8x128xf32, #tpu.memory_space<vmem>>, vector<8x128xf32>,
    %20 = arith.truncf %2 : vector<128x128xf32> to vector<128x128xbf16>
    %c0_9 = arith.constant 0 : index
    %c0_10 = arith.constant 0 : index
    %21 = vector.load %arg3[%c0_9, %c0_10] : memref<128x128xbf16, #tpu.memory_space<vmem>>, vector<128x128xbf16>
    tpu.vector_store %arg3[%c0_9, %c0_10], %20 {strides = array<i32>} : memref<128x128xbf16, #tpu.memory_space<vmem>>, vector<128x128xbf16>,
    return
  }
  func.func @transform_0(%arg0: i32) -> (i32, i32) {
    %c0_i32 = arith.constant 0 : i32
    %c0_i32_0 = arith.constant 0 : i32
    return %arg0, %c0_i32 : i32, i32
  }
  func.func @transform_1(%arg0: i32) -> (i32, i32) {
    %c0_i32 = arith.constant 0 : i32
    %c0_i32_0 = arith.constant 0 : i32
    %c0_i32_1 = arith.constant 0 : i32
    return %c0_i32, %c0_i32_0 : i32, i32
  }
  func.func @transform_2(%arg0: i32) -> (i32, i32) {
    %c0_i32 = arith.constant 0 : i32
    %c0_i32_0 = arith.constant 0 : i32
    return %arg0, %c0_i32 : i32, i32
  }
  func.func @transform_3(%arg0: i32) -> (i32, i32) {
    %c0_i32 = arith.constant 0 : i32
    %c0_i32_0 = arith.constant 0 : i32
    return %arg0, %c0_i32 : i32, i32
  }
}

module attributes {stable_mosaic.version = 11 : i64} {
  func.func @_layer_kernel(%arg0: i32, %arg1: memref<2x128xf32, #tpu.memory_space<vmem>>, %arg2: memref<128x128xbf16, #tpu.memory_space<vmem>>, %arg3: memref<128x128xbf16, #tpu.memory_space<vmem>>, %arg4: memref<16x128xf32, #tpu.memory_space<vmem>>, %arg5: memref<16x128xf32, #tpu.memory_space<vmem>>, %arg6: memref<8x128xf32, #tpu.memory_space<vmem>>) attributes {dimension_semantics = [#tpu.dimension_semantics<parallel>], iteration_bounds = array<i64: 1>, scalar_prefetch = 0 : i64, scratch_operands = 0 : i64, tpu.core_type = #tpu.core_type<tc>, window_params = [{pipeline_mode = #tpu.pipeline_mode<synchronous>, transform_indices = @transform_0, window_bounds = array<i64: 2, 128>}, {transform_indices = @transform_1, window_bounds = array<i64: 128, 128>}, {pipeline_mode = #tpu.pipeline_mode<synchronous>, transform_indices = @transform_2, window_bounds = array<i64: 128, 128>}, {transform_indices = @transform_3, window_bounds = array<i64: 16, 128>}, {transform_indices = @transform_4, window_bounds = array<i64: 16, 128>}, {transform_indices = @transform_5, window_bounds = array<i64: 8, 128>}]} {
    %c0 = arith.constant 0 : index
    %c0_0 = arith.constant 0 : index
    %0 = vector.load %arg2[%c0, %c0_0] : memref<128x128xbf16, #tpu.memory_space<vmem>>, vector<128x128xbf16>
    %1 = arith.extf %0 : vector<128x128xbf16> to vector<128x128xf32>
    %c0_1 = arith.constant 0 : index
    %c0_2 = arith.constant 0 : index
    %2 = vector.load %arg1[%c0_1, %c0_2] : memref<2x128xf32, #tpu.memory_space<vmem>>, vector<1x128xf32>
    %3 = vector.broadcast %2 : vector<1x128xf32> to vector<128x128xf32>
    %4 = arith.mulf %1, %3 : vector<128x128xf32>
    %c1 = arith.constant 1 : index
    %c0_3 = arith.constant 0 : index
    %5 = vector.load %arg1[%c1, %c0_3] : memref<2x128xf32, #tpu.memory_space<vmem>>, vector<1x128xf32>
    %6 = vector.broadcast %5 : vector<1x128xf32> to vector<128x128xf32>
    %7 = arith.addf %4, %6 : vector<128x128xf32>
    %cst = arith.constant 0.000000e+00 : f32
    %8 = vector.broadcast %cst : f32 to vector<128x128xf32>
    %9 = arith.maximumf %7, %8 : vector<128x128xf32>
    %10 = arith.truncf %9 : vector<128x128xf32> to vector<128x128xbf16>
    %c0_4 = arith.constant 0 : index
    %c0_5 = arith.constant 0 : index
    %11 = vector.load %arg3[%c0_4, %c0_5] : memref<128x128xbf16, #tpu.memory_space<vmem>>, vector<128x128xbf16>
    %cst_6 = arith.constant dense<0.000000e+00> : vector<128x128xf32>
    %12 = tpu.matmul %10, %11, %cst_6 {dimension_numbers = #tpu.dot_dimension_numbers<[1], [0], [0], [1], [0, 0, 1, 1], [], []>} : vector<128x128xbf16>, vector<128x128xbf16>, vector<128x128xf32> -> vector<128x128xf32>
    %cst_7 = arith.constant 1.000000e+00 : f32
    %13 = vector.broadcast %cst_7 : f32 to vector<1x128xf32>
    %cst_8 = arith.constant dense<0.000000e+00> : vector<1x128xf32>
    %14 = tpu.matmul %13, %12, %cst_8 {dimension_numbers = #tpu.dot_dimension_numbers<[1], [0], [0], [1], [0, 0, 1, 1], [], []>} : vector<1x128xf32>, vector<128x128xf32>, vector<1x128xf32> -> vector<1x128xf32>
    %15 = arith.mulf %12, %12 : vector<128x128xf32>
    %cst_9 = arith.constant dense<0.000000e+00> : vector<1x128xf32>
    %16 = tpu.matmul %13, %15, %cst_9 {dimension_numbers = #tpu.dot_dimension_numbers<[1], [0], [0], [1], [0, 0, 1, 1], [], []>} : vector<1x128xf32>, vector<128x128xf32>, vector<1x128xf32> -> vector<1x128xf32>
    %17 = tpu.iota {dimensions = array<i32: 0>} : vector<8x128xi32>
    %c0_i32 = arith.constant 0 : i32
    %18 = vector.broadcast %c0_i32 : i32 to vector<8x128xi32>
    %19 = arith.cmpi eq, %17, %18 : vector<8x128xi32>
    %c1_i32 = arith.constant 1 : i32
    %20 = vector.broadcast %c1_i32 : i32 to vector<8x128xi32>
    %21 = arith.cmpi eq, %17, %20 : vector<8x128xi32>
    %cst_10 = arith.constant 0.000000e+00 : f32
    %22 = vector.shape_cast %16 : vector<1x128xf32> to vector<1x128xf32>
    %23 = vector.broadcast %22 : vector<1x128xf32> to vector<8x128xf32>
    %24 = vector.broadcast %cst_10 : f32 to vector<8x128xf32>
    %25 = arith.select %21, %23, %24 : vector<8x128xi1>, vector<8x128xf32>
    %26 = vector.shape_cast %14 : vector<1x128xf32> to vector<1x128xf32>
    %27 = vector.broadcast %26 : vector<1x128xf32> to vector<8x128xf32>
    %28 = arith.select %19, %27, %25 : vector<8x128xi1>, vector<8x128xf32>
    %c0_11 = arith.constant 0 : index
    %c0_12 = arith.constant 0 : index
    %29 = vector.load %arg6[%c0_11, %c0_12] : memref<8x128xf32, #tpu.memory_space<vmem>>, vector<8x128xf32>
    tpu.vector_store %arg6[%c0_11, %c0_12], %28 {strides = array<i32>} : memref<8x128xf32, #tpu.memory_space<vmem>>, vector<8x128xf32>,
    %30 = vector.shape_cast %12 : vector<128x128xf32> to vector<16x8x128xf32>
    %cst_13 = arith.constant dense<0xFF800000> : vector<16x128xf32>
    %31 = vector.multi_reduction <maximumf>, %30, %cst_13 [1] : vector<16x8x128xf32> to vector<16x128xf32>
    %c0_14 = arith.constant 0 : index
    %c0_15 = arith.constant 0 : index
    %32 = vector.load %arg4[%c0_14, %c0_15] : memref<16x128xf32, #tpu.memory_space<vmem>>, vector<16x128xf32>
    tpu.vector_store %arg4[%c0_14, %c0_15], %31 {strides = array<i32>} : memref<16x128xf32, #tpu.memory_space<vmem>>, vector<16x128xf32>,
    %cst_16 = arith.constant dense<0x7F800000> : vector<16x128xf32>
    %33 = vector.multi_reduction <minimumf>, %30, %cst_16 [1] : vector<16x8x128xf32> to vector<16x128xf32>
    %c0_17 = arith.constant 0 : index
    %c0_18 = arith.constant 0 : index
    %34 = vector.load %arg5[%c0_17, %c0_18] : memref<16x128xf32, #tpu.memory_space<vmem>>, vector<16x128xf32>
    tpu.vector_store %arg5[%c0_17, %c0_18], %33 {strides = array<i32>} : memref<16x128xf32, #tpu.memory_space<vmem>>, vector<16x128xf32>,
    return
  }
  func.func @transform_0(%arg0: i32) -> (i32, i32) {
    %c0_i32 = arith.constant 0 : i32
    %c0_i32_0 = arith.constant 0 : i32
    %c0_i32_1 = arith.constant 0 : i32
    return %c0_i32, %c0_i32_0 : i32, i32
  }
  func.func @transform_1(%arg0: i32) -> (i32, i32) {
    %c0_i32 = arith.constant 0 : i32
    %c0_i32_0 = arith.constant 0 : i32
    return %arg0, %c0_i32 : i32, i32
  }
  func.func @transform_2(%arg0: i32) -> (i32, i32) {
    %c0_i32 = arith.constant 0 : i32
    %c0_i32_0 = arith.constant 0 : i32
    %c0_i32_1 = arith.constant 0 : i32
    return %c0_i32, %c0_i32_0 : i32, i32
  }
  func.func @transform_3(%arg0: i32) -> (i32, i32) {
    %c0_i32 = arith.constant 0 : i32
    %c0_i32_0 = arith.constant 0 : i32
    return %arg0, %c0_i32 : i32, i32
  }
  func.func @transform_4(%arg0: i32) -> (i32, i32) {
    %c0_i32 = arith.constant 0 : i32
    %c0_i32_0 = arith.constant 0 : i32
    return %arg0, %c0_i32 : i32, i32
  }
  func.func @transform_5(%arg0: i32) -> (i32, i32) {
    %c0_i32 = arith.constant 0 : i32
    %c0_i32_0 = arith.constant 0 : i32
    return %arg0, %c0_i32 : i32, i32
  }
}

</mosaic_0001>

<bundles_post_ra>
// kernel: custom-call.8
= control target key start
LH: loop header
LB: loop body
LE: loop exit
PB: predicated region body
PF: predicated region fallthrough
CT: control target
= control target key end

     0   :  { %s6_s0 = inlined_call_operand.vmem [shape: f32[2,32], index: 0, kind: output, shape index: {}]  }

// kernel: _forward_impl.3
= control target key start
LH: loop header
LB: loop body
LE: loop exit
PB: predicated region body
PF: predicated region fallthrough
CT: control target
= control target key end

     0   :  { %vm940_vm0 = vmmov 0   ;;  %vm560_vm1 = vcmask 1041409   ;;  %vm562_vm2 = vcmask 1042434   ;;  %vm564_vm3 = vcmask 1043459   ;;  %s1267_s2 = inlined_call_operand.vmem [shape: bf16[128,128], index: 2, kind: input, shape index: {}]   ;;  %s1268_s0 = inlined_call_operand.vmem [shape: f32[2,128], index: 0, kind: input, shape index: {}]   ;;  %s1269_s1 = inlined_call_operand.vmem [shape: bf16[128,128], index: 1, kind: input, shape index: {}]   ;;  %s1270_s3 = inlined_call_operand.vmem [shape: f32[16,128], index: 3, kind: output, shape index: {0}]   ;;  %s1271_s4 = inlined_call_operand.vmem [shape: f32[16,128], index: 4, kind: output, shape index: {1}]   ;;  %s1272_s5 = inlined_call_operand.vmem [shape: f32[8,128], index: 5, kind: output, shape index: {2}]  }
   0x1   :  { %v931_v0 = vld [vmem:[%s1267_s2 + $0x38] sm:$0xff]   ;;  %v932_v1 = vld [vmem:[%s1267_s2 + $0x30] sm:$0xff]   ;;  %v933_v2 = vld [vmem:[%s1267_s2 + $0x28] sm:$0xff]   ;;  %vm566_vm4 = vcmask 1044484   ;;  %vm568_vm5 = vcmask 1045509   ;;  %vm570_vm6 = vcmask 1046534  }
   0x2   :  { %826 = vmatprep.subr.bf16.mxu0 %v931_v0  ;;  %v934_v3 = vld [vmem:[%s1267_s2 + $0x20] sm:$0xff]   ;;  %v769_v11 = vld [vmem:[%s1269_s1 + $0x8] sm:$0xff]   ;;  %v770_v12 = vld [vmem:[%s1269_s1 + $0x10] sm:$0xff]   ;;  %vm572_vm7 = vcmask 1047559  }
   0x3   :  { %827 = vmatpush3.bf16.msra.mxu0 %v931_v0  ;;  %v738_v4 = vld [vmem:[%s1269_s1] sm:$0xff]   ;;  %v935_v13 = vld [vmem:[%s1267_s2 + $0x18] sm:$0xff]   ;;  %v743_v16 = vunpack.c.l.bf16 %v769_v11  ;;  %v744_v17 = vunpack.c.h.bf16 %v769_v11  ;;  %v747_v18 = vunpack.c.l.bf16 %v770_v12  ;;  %v748_v19 = vunpack.c.h.bf16 %v770_v12  ;;  %v936_v22 = vld [vmem:[%s1267_s2 + $0x10] sm:$0xff]  }
   0x4   :  { %828 = vmatprep.subr.bf16.mxu0 %v932_v1  ;;  %v990_v5 = vld [vmem:[%s1268_s0] ss:$0 sm:$0xff]  ;;  %v739_v6 = vunpack.c.l.bf16 %v738_v4  ;;  %v740_v7 = vunpack.c.h.bf16 %v738_v4  ;;  %v995_v8 = vld [vmem:[%s1268_s0 + $0x1] ss:$0 sm:$0xff]  ;;  %v771_v28 = vld [vmem:[%s1269_s1 + $0x18] sm:$0xff]  }
   0x5   :  { %v57_v24 = vmul.f32 %v743_v16, %v990_v5  ;;  %v58_v25 = vmul.f32 %v744_v17, %v990_v5  ;;  %v59_v26 = vmul.f32 %v747_v18, %v990_v5  ;;  %v60_v27 = vmul.f32 %v748_v19, %v990_v5  ;;  %v937_v29 = vld [vmem:[%s1267_s2 + $0x8] sm:$0xff]   ;;  %v772_v30 = vld [vmem:[%s1269_s1 + $0x20] sm:$0xff]   ;;  %v774_v49 = vld [vmem:[%s1269_s1 + $0x30] sm:$0xff]  }
   0x6   :  { %v55_v9 = vmul.f32 %v739_v6, %v990_v5  ;;  %v56_v10 = vmul.f32 %v740_v7, %v990_v5  ;;  %v751_v31 = vunpack.c.l.bf16 %v771_v28  ;;  %v752_v32 = vunpack.c.h.bf16 %v771_v28  ;;  %v938_v39 = vld [vmem:[%s1267_s2] sm:$0xff]   ;;  %v773_v48 = vld [vmem:[%s1269_s1 + $0x28] sm:$0xff]   ;;  %v775_v4 = vld [vmem:[%s1269_s1 + $0x38] sm:$0xff]  }
   0x7   :  { %829 = vmatpush3.bf16.msra.mxu0 %v932_v1  ;;  %v78_v33 = vadd.f32 %v995_v8, %v57_v24  ;;  %v79_v34 = vadd.f32 %v995_v8, %v58_v25  ;;  %v80_v35 = vadd.f32 %v995_v8, %v59_v26  ;;  %v81_v36 = vadd.f32 %v995_v8, %v60_v27 }
   0x8   :  { %830 = vmatprep.subr.bf16.mxu0 %v933_v2  ;;  %v76_v14 = vadd.f32 %v995_v8, %v55_v9  ;;  %v77_v15 = vadd.f32 %v995_v8, %v56_v10  ;;  %v755_v37 = vunpack.c.l.bf16 %v772_v30  ;;  %v756_v38 = vunpack.c.h.bf16 %v772_v30 }
   0x9   :  { %v61_v40 = vmul.f32 %v751_v31, %v990_v5  ;;  %v62_v41 = vmul.f32 %v752_v32, %v990_v5  ;;  %v94_v42 = vmax.f32 %v78_v33, 0.0  ;;  %v95_v43 = vmax.f32 %v79_v34, 0.0 }
   0xa   :  { %v92_v20 = vmax.f32 %v76_v14, 0.0  ;;  %v93_v21 = vmax.f32 %v77_v15, 0.0  ;;  %v96_v44 = vmax.f32 %v80_v35, 0.0  ;;  %v97_v45 = vmax.f32 %v81_v36, 0.0 }
   0xb   :  { %831 = vmatpush3.bf16.msra.mxu0 %v933_v2  ;;  %v63_v46 = vmul.f32 %v755_v37, %v990_v5  ;;  %v64_v47 = vmul.f32 %v756_v38, %v990_v5  ;;  %v82_v50 = vadd.f32 %v995_v8, %v61_v40  ;;  %v83_v51 = vadd.f32 %v995_v8, %v62_v41 }
   0xc   :  { %832 = vmatprep.subr.bf16.mxu0 %v934_v3  ;;  %v108_v23 = vpack.c.bf16 %v93_v21, %v92_v20  ;;  %v109_v52 = vpack.c.bf16 %v95_v43, %v94_v42  ;;  %v110_v53 = vpack.c.bf16 %v97_v45, %v96_v44  ;;  %v759_v54 = vunpack.c.l.bf16 %v773_v48 }
   0xd   :  { %v760_v55 = vunpack.c.h.bf16 %v773_v48  ;;  %v84_v56 = vadd.f32 %v995_v8, %v63_v46  ;;  %v85_v57 = vadd.f32 %v995_v8, %v64_v47  ;;  %v763_v58 = vunpack.c.l.bf16 %v774_v49 }
   0xe   :  { %842 = vmatprep.mubr.bf16.mxu0 %v108_v23  ;;  %v764_v59 = vunpack.c.h.bf16 %v774_v49  ;;  %v98_v60 = vmax.f32 %v82_v50, 0.0  ;;  %v99_v61 = vmax.f32 %v83_v51, 0.0  ;;  %v65_v62 = vmul.f32 %v759_v54, %v990_v5 }
   0xf   :  { %833 = vmatpush3.bf16.msra.mxu0 %v934_v3  ;;  %v66_v63 = vmul.f32 %v760_v55, %v990_v5  ;;  %v100_v0 = vmax.f32 %v84_v56, 0.0  ;;  %v101_v1 = vmax.f32 %v85_v57, 0.0  ;;  %v67_v2 = vmul.f32 %v763_v58, %v990_v5 }
  0x10   :  { %834 = vmatprep.subr.bf16.mxu0 %v935_v13  ;;  %v68_v3 = vmul.f32 %v764_v59, %v990_v5  ;;  %v111_v6 = vpack.c.bf16 %v99_v61, %v98_v60  ;;  %v86_v7 = vadd.f32 %v995_v8, %v65_v62  ;;  %v767_v10 = vunpack.c.l.bf16 %v775_v4 }
  0x11   :  { %v87_v9 = vadd.f32 %v995_v8, %v66_v63  ;;  %v768_v11 = vunpack.c.h.bf16 %v775_v4  ;;  %v112_v12 = vpack.c.bf16 %v101_v1, %v100_v0  ;;  %v939_v28 = vmov 0.0  }
  0x12   :  { %v89_v14 = vadd.f32 %v995_v8, %v68_v3  ;;  %v102_v15 = vmax.f32 %v86_v7, 0.0  ;;  %v69_v17 = vmul.f32 %v767_v10, %v990_v5  ;;  %858 = vmatprep.subr.mxu1 %v939_v28  ;;  %890 = vmatprep.mubr.msk.f32.mxu1 %vm940_vm0, %v939_v28 }
  0x13   :  { %835 = vmatpush3.bf16.msra.mxu0 %v935_v13  ;;  %v88_v13 = vadd.f32 %v995_v8, %v67_v2  ;;  %v103_v16 = vmax.f32 %v87_v9, 0.0  ;;  %v70_v18 = vmul.f32 %v768_v11, %v990_v5 }
  0x14   :  { %836 = vmatprep.subr.bf16.mxu0 %v936_v22  ;;  %v105_v20 = vmax.f32 %v89_v14, 0.0 }
  0x15   :  { %v104_v19 = vmax.f32 %v88_v13, 0.0  ;;  %v113_v21 = vpack.c.bf16 %v103_v16, %v102_v15  ;;  %v91_v23 = vadd.f32 %v995_v8, %v70_v18 }
  0x17   :  { %837 = vmatpush3.bf16.msra.mxu0 %v936_v22  ;;  %v90_v22 = vadd.f32 %v995_v8, %v69_v17  ;;  %v114_v24 = vpack.c.bf16 %v105_v20, %v104_v19  ;;  %v107_v26 = vmax.f32 %v91_v23, 0.0 }
  0x18   :  { %838 = vmatprep.subr.bf16.mxu0 %v937_v29 }
  0x19   :  { %v106_v25 = vmax.f32 %v90_v22, 0.0 }
  0x1b   :  { %839 = vmatpush3.bf16.msra.mxu0 %v937_v29  ;;  %v115_v27 = vpack.c.bf16 %v107_v26, %v106_v25 }
  0x1c   :  { %840 = vmatprep.subr.bf16.mxu0 %v938_v39 }
  0x1f   :  { %841 = vmatpush3.bf16.msra.mxu0 %v938_v39 }
  0x20   :  { %893 = vmatprep.subr.mxu0 %v939_v28 }
  0x22   :  { %843 = vmatmul.mubr.bf16.vlgmr.msra.gmra.mxu0 %v109_v52 }
  0x23   :  { %846 = vmatprep.mubr.bf16.mxu0 %v110_v53 }
  0x2a   :  { %847 = vmatmul.mubr.bf16.gmra.mxu0 %v111_v6 }
  0x2b   :  { %850 = vmatprep.mubr.bf16.mxu0 %v112_v12 }
  0x32   :  { %851 = vmatmul.mubr.bf16.gmra.mxu0 %v113_v21 }
  0x33   :  { %854 = vmatprep.mubr.bf16.mxu0 %v114_v24 }
  0x3a   :  { %855 = vmatmul.mubr.bf16.gmra.mxu0 %v115_v27 }
  0x3b   :  { %925 = vmatprep.mubr.msk.f32.mxu0 %vm940_vm0, %v939_v28 }
  0xe2   :  { %v1066_v5 = vpop.f32.mrf.mxu0 }
  0xe3   :  { %v460_v8 = vrot.slane %v1066_v5, 4 }
  0xe4   :  { %v1069_v29 = vpop.f32.mrf.mxu0 }
  0xe5   :  { %v461_v30 = vmax.f32 %v1066_v5, %v460_v8  ;;  %v598_v31 = vmin.f32 %v1066_v5, %v460_v8  ;;  %v448_v32 = vrot.slane %v1069_v29, 4 }
  0xe6   :  { %v1074_v33 = vpop.f32.mrf.mxu0 }
  0xe7   :  { %v449_v34 = vmax.f32 %v1069_v29, %v448_v32  ;;  %v586_v35 = vmin.f32 %v1069_v29, %v448_v32  ;;  %v462_v36 = vrot.slane %v461_v30, 2  ;;  %v599_v37 = vrot.slane %v598_v31, 2 }
  0xe8   :  { %v466_v38 = vrot.slane %v1074_v33, 4  ;;  %v1079_v39 = vpop.f32.mrf.mxu0 }
  0xe9   :  { %v450_v40 = vrot.slane %v449_v34, 2  ;;  %v587_v41 = vrot.slane %v586_v35, 2  ;;  %v454_v43 = vrot.slane %v1079_v39, 4  ;;  %v463_v47 = vmax.f32 %v461_v30, %v462_v36 }
  0xea   :  { %v467_v42 = vmax.f32 %v1074_v33, %v466_v38  ;;  %v1083_v44 = vpop.f32.mrf.mxu0  ;;  %v604_v46 = vmin.f32 %v1074_v33, %v466_v38  ;;  %v600_v48 = vmin.f32 %v598_v31, %v599_v37 }
  0xeb   :  { %v451_v45 = vmax.f32 %v449_v34, %v450_v40  ;;  %v455_v49 = vmax.f32 %v1079_v39, %v454_v43  ;;  %v592_v50 = vmin.f32 %v1079_v39, %v454_v43  ;;  %v588_v52 = vmin.f32 %v586_v35, %v587_v41 }
  0xec   :  { %v1088_v51 = vpop.f32.mrf.mxu0  ;;  %v468_v53 = vrot.slane %v467_v42, 2  ;;  %v605_v58 = vrot.slane %v604_v46, 2  ;;  %v484_v59 = vrot.slane %v1083_v44, 4  ;;  %v464_v61 = vrot.slane %v463_v47, 1 }
  0xed   :  { %v456_v54 = vrot.slane %v455_v49, 2  ;;  %v593_v55 = vrot.slane %v592_v50, 2  ;;  %v452_v57 = vrot.slane %v451_v45, 1  ;;  %v472_v60 = vrot.slane %v1088_v51, 4 }
  0xee   :  { %v1090_v56 = vpop.f32.mrf.mxu0  ;;  %v601_v62 = vrot.slane %v600_v48, 1  ;;  %v485_v2 = vmax.f32 %v1083_v44, %v484_v59  ;;  %v622_v3 = vmin.f32 %v1083_v44, %v484_v59  ;;  %v589_v7 = vrot.slane %v588_v52, 1 }
  0xef   :  { %v457_v63 = vmax.f32 %v455_v49, %v456_v54  ;;  %v594_v0 = vmin.f32 %v592_v50, %v593_v55  ;;  %v473_v4 = vmax.f32 %v1088_v51, %v472_v60  ;;  %v610_v6 = vmin.f32 %v1088_v51, %v472_v60 }
  0xf0   :  { %v1094_v1 = vpop.f32.mrf.mxu0  ;;  %v469_v9 = vmax.f32 %v467_v42, %v468_v53  ;;  %v453_v13 = vmax.f32 %v451_v45, %v452_v57  ;;  %v606_v14 = vmin.f32 %v604_v46, %v605_v58  ;;  %v486_v18 = vrot.slane %v485_v2, 2 }
  0xf1   :  { %v458_v10 = vrot.slane %v457_v63, 1  ;;  %v595_v11 = vrot.slane %v594_v0, 1  ;;  %v474_v15 = vrot.slane %v473_v4, 2  ;;  %v611_v16 = vrot.slane %v610_v6, 2 }
  0xf2   :  { %v1100_v12 = vpop.f32.mrf.mxu0  ;;  %v623_v19 = vrot.slane %v622_v3, 2  ;;  %v490_v20 = vrot.slane %v1090_v56, 4  ;;  %v478_v24 = vrot.slane %v1094_v1, 4  ;;  %v465_v31 = vmax.f32 %v463_v47, %v464_v61 }
  0xf3   :  { %v459_v17 = vmax.f32 %v457_v63, %v458_v10  ;;  %v596_v22 = vmin.f32 %v594_v0, %v595_v11  ;;  %v475_v23 = vmax.f32 %v473_v4, %v474_v15  ;;  %v612_v26 = vmin.f32 %v610_v6, %v611_v16 }
  0xf4   :  { %v1103_v21 = vpop.f32.mrf.mxu0  ;;  %v491_v27 = vmax.f32 %v1090_v56, %v490_v20  ;;  %v628_v8 = vmin.f32 %v1090_v56, %v490_v20  ;;  %v590_v32 = vmin.f32 %v588_v52, %v589_v7  ;;  %v470_v34 = vrot.slane %v469_v9, 1 }
  0xf5   :  { %v561_v25 = vsel %vm560_vm1, %v459_v17, %v453_v13  ;;  %v602_v35 = vmin.f32 %v600_v48, %v601_v62  ;;  %v607_v36 = vrot.slane %v606_v14, 1  ;;  %v487_v37 = vmax.f32 %v485_v2, %v486_v18 }
  0xf6   :  { %v1109_v30 = vpop.f32.mrf.mxu0  ;;  %v624_v38 = vmin.f32 %v622_v3, %v623_v19  ;;  %v563_v41 = vsel %vm562_vm2, %v465_v31, %v561_v25  ;;  %v697_v42 = vsel %vm560_vm1, %v596_v22, %v590_v32  ;;  %v492_v43 = vrot.slane %v491_v27, 2 }
  0xf7   :  { %v629_v45 = vrot.slane %v628_v8, 2  ;;  %v476_v46 = vrot.slane %v475_v23, 1  ;;  %v613_v49 = vrot.slane %v612_v26, 1  ;;  %v479_v47 = vmax.f32 %v1094_v1, %v478_v24 }
  0xf8   :  { %v1111_v40 = vpop.f32.mrf.mxu0  ;;  %v616_v50 = vmin.f32 %v1094_v1, %v478_v24  ;;  %v471_v52 = vmax.f32 %v469_v9, %v470_v34  ;;  %v493_v53 = vmax.f32 %v491_v27, %v492_v43  ;;  %v508_v55 = vrot.slane %v1100_v12, 4 }
  0xf9   :  { %v630_v54 = vmin.f32 %v628_v8, %v629_v45  ;;  %v698_v57 = vsel %vm562_vm2, %v602_v35, %v697_v42  ;;  %v480_v58 = vrot.slane %v479_v47, 2  ;;  %v496_v60 = vrot.slane %v1103_v21, 4 }
  0xfa   :  { %v1117_v48 = vpop.f32.mrf.mxu0  ;;  %v617_v59 = vrot.slane %v616_v50, 2  ;;  %v608_v62 = vmin.f32 %v606_v14, %v607_v36  ;;  %v488_v63 = vrot.slane %v487_v37, 1  ;;  %v625_v0 = vrot.slane %v624_v38, 1 }
  0xfb   :  { %v565_v2 = vsel %vm564_vm3, %v471_v52, %v563_v41  ;;  %v477_v3 = vmax.f32 %v475_v23, %v476_v46  ;;  %v614_v4 = vmin.f32 %v612_v26, %v613_v49  ;;  %v481_v6 = vmax.f32 %v479_v47, %v480_v58 }
  0xfc   :  { %v1122_v61 = vpop.f32.mrf.mxu0  ;;  %v618_v7 = vmin.f32 %v616_v50, %v617_v59  ;;  %v699_v10 = vsel %vm564_vm3, %v608_v62, %v698_v57  ;;  %v494_v11 = vrot.slane %v493_v53, 1  ;;  %v631_v13 = vrot.slane %v630_v54, 1 }
  0xfd   :  { %v509_v15 = vmax.f32 %v1100_v12, %v508_v55  ;;  %v482_v16 = vrot.slane %v481_v6, 1  ;;  %v646_v17 = vmin.f32 %v1100_v12, %v508_v55  ;;  %v497_v18 = vmax.f32 %v1103_v21, %v496_v60 }
  0xfe   :  { %v1125_v9 = vpop.f32.mrf.mxu0  ;;  %v619_v14 = vrot.slane %v618_v7, 1  ;;  %v489_v19 = vmax.f32 %v487_v37, %v488_v63  ;;  %v626_v20 = vmin.f32 %v624_v38, %v625_v0  ;;  %v634_v22 = vmin.f32 %v1103_v21, %v496_v60 }
  0xff   :  { %859 = vmatpush3.msra.mxu1 %v1125_v9  ;;  %v514_v23 = vrot.slane %v1109_v30, 4  ;;  %v567_v24 = vsel %vm566_vm4, %v477_v3, %v565_v2  ;;  %v700_v25 = vsel %vm566_vm4, %v614_v4, %v699_v10  ;;  %v483_v26 = vmax.f32 %v481_v6, %v482_v16 }
 0x100   :  { %860 = vmatprep.subr.mxu1 %v939_v28  ;;  %v620_v27 = vmin.f32 %v618_v7, %v619_v14  ;;  %v1138_v8 = vpop.f32.mrf.mxu0  ;;  %v495_v31 = vmax.f32 %v493_v53, %v494_v11  ;;  %v632_v32 = vmin.f32 %v630_v54, %v631_v13  ;;  %v510_v34 = vrot.slane %v509_v15, 2 }
 0x101   :  { %861 = vmatpush3.msra.mxu1 %v1117_v48  ;;  %v502_v35 = vrot.slane %v1111_v40, 4  ;;  %v569_v36 = vsel %vm568_vm5, %v483_v26, %v567_v24  ;;  %v647_v38 = vrot.slane %v646_v17, 2  ;;  %v498_v41 = vrot.slane %v497_v18, 2 }
 0x102   :  { %862 = vmatprep.subr.mxu1 %v939_v28  ;;  %v701_v37 = vsel %vm568_vm5, %v620_v27, %v700_v25  ;;  %v571_v42 = vsel %vm570_vm6, %v489_v19, %v569_v36  ;;  %v635_v45 = vrot.slane %v634_v22, 2  ;;  %v515_v46 = vmax.f32 %v1109_v30, %v514_v23 }
 0x103   :  { %863 = vmatpush3.msra.mxu1 %v1138_v8  ;;  %v702_v43 = vsel %vm570_vm6, %v626_v20, %v701_v37  ;;  %v573_v49 = vsel %vm572_vm7, %v495_v31, %v571_v42  ;;  %v652_v50 = vmin.f32 %v1109_v30, %v514_v23  ;;  %v511_v52 = vmax.f32 %v509_v15, %v510_v34 }
 0x104   :  { %864 = vmatprep.subr.mxu1 %v939_v28  ;;  %v703_v47 = vsel %vm572_vm7, %v632_v32, %v702_v43  ;;  %583 = vst [vmem:[%s1270_s3] sm:$0xff] %v573_v49  ;;  %v503_v53 = vmax.f32 %v1111_v40, %v502_v35  ;;  %v640_v54 = vmin.f32 %v1111_v40, %v502_v35  ;;  %v532_v58 = vrot.slane %v1117_v48, 4 }
 0x105   :  { %865 = vmatpush3.msra.mxu1 %v1122_v61  ;;  %713 = vst [vmem:[%s1271_s4] sm:$0xff] %v703_v47  ;;  %v648_v55 = vmin.f32 %v646_v17, %v647_v38  ;;  %v499_v57 = vmax.f32 %v497_v18, %v498_v41  ;;  %v520_v59 = vrot.slane %v1122_v61, 4  ;;  %v636_v60 = vmin.f32 %v634_v22, %v635_v45 }
 0x106   :  { %866 = vmatprep.subr.mxu1 %v939_v28  ;;  %v516_v62 = vrot.slane %v515_v46, 2  ;;  %v504_v63 = vrot.slane %v503_v53, 2  ;;  %v641_v0 = vrot.slane %v640_v54, 2  ;;  %v653_v2 = vrot.slane %v652_v50, 2 }
 0x107   :  { %867 = vmatpush3.msra.mxu1 %v1109_v30  ;;  %v533_v3 = vmax.f32 %v1117_v48, %v532_v58  ;;  %v521_v4 = vmax.f32 %v1122_v61, %v520_v59  ;;  %v658_v6 = vmin.f32 %v1122_v61, %v520_v59  ;;  %v670_v11 = vmin.f32 %v1117_v48, %v532_v58 }
 0x108   :  { %868 = vmatprep.subr.mxu1 %v939_v28  ;;  %v505_v7 = vmax.f32 %v503_v53, %v504_v63  ;;  %v642_v10 = vmin.f32 %v640_v54, %v641_v0  ;;  %v538_v13 = vrot.slane %v1125_v9, 4  ;;  %v512_v15 = vrot.slane %v511_v52, 1 }
 0x109   :  { %869 = vmatpush3.msra.mxu1 %v1100_v12  ;;  %v500_v16 = vrot.slane %v499_v57, 1  ;;  %v522_v14 = vrot.slane %v521_v4, 2  ;;  %v517_v17 = vmax.f32 %v515_v46, %v516_v62  ;;  %v659_v20 = vrot.slane %v658_v6, 2 }
 0x10a   :  { %870 = vmatprep.subr.mxu1 %v939_v28  ;;  %v506_v18 = vrot.slane %v505_v7, 1  ;;  %v643_v19 = vrot.slane %v642_v10, 1  ;;  %v649_v22 = vrot.slane %v648_v55, 1  ;;  %v637_v23 = vrot.slane %v636_v60, 1 }
 0x10b   :  { %871 = vmatpush3.msra.mxu1 %v1111_v40  ;;  %v654_v24 = vmin.f32 %v652_v50, %v653_v2  ;;  %v534_v25 = vrot.slane %v533_v3, 2  ;;  %v671_v27 = vrot.slane %v670_v11, 2  ;;  %v539_v31 = vmax.f32 %v1125_v9, %v538_v13 }
 0x10c   :  { %872 = vmatprep.subr.mxu1 %v939_v28  ;;  %v507_v26 = vmax.f32 %v505_v7, %v506_v18  ;;  %v676_v32 = vmin.f32 %v1125_v9, %v538_v13  ;;  %v644_v34 = vmin.f32 %v642_v10, %v643_v19  ;;  %v523_v35 = vmax.f32 %v521_v4, %v522_v14 }
 0x10d   :  { %873 = vmatpush3.msra.mxu1 %v1103_v21  ;;  %v526_v36 = vrot.slane %v1138_v8, 4  ;;  %v501_v37 = vmax.f32 %v499_v57, %v500_v16  ;;  %v518_v38 = vrot.slane %v517_v17, 1  ;;  %v660_v41 = vmin.f32 %v658_v6, %v659_v20 }
 0x10e   :  { %874 = vmatprep.subr.mxu1 %v939_v28  ;;  %v540_v42 = vrot.slane %v539_v31, 2  ;;  %v513_v43 = vmax.f32 %v511_v52, %v512_v15  ;;  %v650_v45 = vmin.f32 %v648_v55, %v649_v22  ;;  %v638_v46 = vmin.f32 %v636_v60, %v637_v23 }
 0x10f   :  { %875 = vmatpush3.msra.mxu1 %v1090_v56  ;;  %v677_v49 = vrot.slane %v676_v32, 2  ;;  %v655_v47 = vrot.slane %v654_v24, 1  ;;  %v574_v50 = vsel %vm560_vm1, %v507_v26, %v501_v37  ;;  %v535_v53 = vmax.f32 %v533_v3, %v534_v25 }
 0x110   :  { %876 = vmatprep.subr.mxu1 %v939_v28  ;;  %v672_v54 = vmin.f32 %v670_v11, %v671_v27  ;;  %v704_v57 = vsel %vm560_vm1, %v644_v34, %v638_v46  ;;  %v524_v58 = vrot.slane %v523_v35, 1  ;;  %v527_v59 = vmax.f32 %v1138_v8, %v526_v36 }
 0x111   :  { %877 = vmatpush3.msra.mxu1 %v1083_v44  ;;  %v664_v62 = vmin.f32 %v1138_v8, %v526_v36  ;;  %v519_v52 = vmax.f32 %v517_v17, %v518_v38  ;;  %v661_v55 = vrot.slane %v660_v41, 1  ;;  %v541_v60 = vmax.f32 %v539_v31, %v540_v42 }
 0x112   :  { %878 = vmatprep.subr.mxu1 %v939_v28  ;;  %v362_v63 = vmul.f32 %v1125_v9, %v1125_v9  ;;  %v575_v0 = vsel %vm562_vm2, %v513_v43, %v574_v50  ;;  %v678_v2 = vmin.f32 %v676_v32, %v677_v49  ;;  %v528_v3 = vrot.slane %v527_v59, 2 }
 0x113   :  { %879 = vmatpush3.msra.mxu1 %v1094_v1  ;;  %v665_v4 = vrot.slane %v664_v62, 2  ;;  %v705_v6 = vsel %vm562_vm2, %v650_v45, %v704_v57  ;;  %v536_v7 = vrot.slane %v535_v53, 1  ;;  %v673_v10 = vrot.slane %v672_v54, 1 }
 0x114   :  { %880 = vmatprep.subr.mxu1 %v939_v28  ;;  %894 = vmatpush3.msra.mxu0 %v362_v63  ;;  %v361_v11 = vmul.f32 %v1117_v48, %v1117_v48  ;;  %v656_v13 = vmin.f32 %v654_v24, %v655_v47  ;;  %v525_v15 = vmax.f32 %v523_v35, %v524_v58  ;;  %v542_v18 = vrot.slane %v541_v60, 1 }
 0x115   :  { %881 = vmatpush3.msra.mxu1 %v1088_v51  ;;  %v529_v9 = vmax.f32 %v527_v59, %v528_v3  ;;  %v666_v16 = vmin.f32 %v664_v62, %v665_v4  ;;  %895 = vmatprep.subr.mxu0 %v939_v28  ;;  %v576_v14 = vsel %vm564_vm3, %v519_v52, %v575_v0  ;;  %v679_v22 = vrot.slane %v678_v2, 1 }
 0x116   :  { %882 = vmatprep.subr.mxu1 %v939_v28  ;;  %v662_v17 = vmin.f32 %v660_v41, %v661_v55  ;;  %896 = vmatpush3.msra.mxu0 %v361_v11  ;;  %v360_v19 = vmul.f32 %v1138_v8, %v1138_v8  ;;  %v706_v20 = vsel %vm564_vm3, %v656_v13, %v705_v6  ;;  %v941_v45 = vmov 1.0  }
 0x117   :  { %v530_v23 = vrot.slane %v529_v9, 1  ;;  %v667_v25 = vrot.slane %v666_v16, 1  ;;  %897 = vmatprep.subr.mxu0 %v939_v28  ;;  %883 = vmatpush3.msra.mxu1 %v1074_v33  ;;  %v537_v48 = vmax.f32 %v535_v53, %v536_v7  ;;  %v674_v24 = vmin.f32 %v672_v54, %v673_v10 }
 0x118   :  { %898 = vmatpush3.msra.mxu0 %v360_v19  ;;  %v359_v26 = vmul.f32 %v1122_v61, %v1122_v61  ;;  %884 = vmatprep.subr.mxu1 %v939_v28  ;;  %v577_v27 = vsel %vm566_vm4, %v525_v15, %v576_v14  ;;  %v707_v32 = vsel %vm566_vm4, %v662_v17, %v706_v20  ;;  %v433_v53 = vlaneseq }
 0x119   :  { %v531_v8 = vmax.f32 %v529_v9, %v530_v23  ;;  %v668_v31 = vmin.f32 %v666_v16, %v667_v25  ;;  %899 = vmatprep.subr.mxu0 %v939_v28  ;;  %885 = vmatpush3.msra.mxu1 %v1066_v5  ;;  %v543_v34 = vmax.f32 %v541_v60, %v542_v18 }
 0x11a   :  { %900 = vmatpush3.msra.mxu0 %v359_v26  ;;  %v358_v35 = vmul.f32 %v1109_v30, %v1109_v30  ;;  %886 = vmatprep.subr.mxu1 %v939_v28  ;;  %v680_v61 = vmin.f32 %v678_v2, %v679_v22  ;;  %v357_v42 = vmul.f32 %v1100_v12, %v1100_v12 }
 0x11b   :  { %v578_v36 = vsel %vm568_vm5, %v531_v8, %v577_v27  ;;  %v708_v37 = vsel %vm568_vm5, %v668_v31, %v707_v32  ;;  %901 = vmatprep.subr.mxu0 %v939_v28  ;;  %887 = vmatpush3.msra.mxu1 %v1079_v39  ;;  %v356_v12 = vmul.f32 %v1111_v40, %v1111_v40 }
 0x11c   :  { %v579_v38 = vsel %vm570_vm6, %v537_v48, %v578_v36  ;;  %v709_v41 = vsel %vm570_vm6, %v674_v24, %v708_v37  ;;  %902 = vmatpush3.msra.mxu0 %v358_v35  ;;  %888 = vmatprep.subr.mxu1 %v939_v28  ;;  %v355_v46 = vmul.f32 %v1103_v21, %v1103_v21 }
 0x11d   :  { %v580_v30 = vsel %vm572_vm7, %v543_v34, %v579_v38  ;;  %v710_v43 = vsel %vm572_vm7, %v680_v61, %v709_v41  ;;  %903 = vmatprep.subr.mxu0 %v939_v28  ;;  %889 = vmatpush3.msra.mxu1 %v1069_v29  ;;  %v354_v49 = vmul.f32 %v1090_v56, %v1090_v56 }
 0x11e   :  { %584 = vst [vmem:[%s1270_s3 + $0x8] sm:$0xff] %v580_v30  ;;  %714 = vst [vmem:[%s1271_s4 + $0x8] sm:$0xff] %v710_v43  ;;  %904 = vmatpush3.msra.mxu0 %v357_v42  ;;  %891 = vmatmul.mubr.f32.vlgmr.msra.gmra.mxu1 %v941_v45  ;;  %v353_v40 = vmul.f32 %v1083_v44, %v1083_v44  ;;  %v352_v47 = vmul.f32 %v1094_v1, %v1094_v1 }
 0x11f   :  { %905 = vmatprep.subr.mxu0 %v939_v28  ;;  %v351_v21 = vmul.f32 %v1088_v51, %v1088_v51  ;;  %v350_v56 = vmul.f32 %v1074_v33, %v1074_v33  ;;  %v349_v44 = vmul.f32 %v1066_v5, %v1066_v5  ;;  %v348_v1 = vmul.f32 %v1079_v39, %v1079_v39 }
 0x120   :  { %906 = vmatpush3.msra.mxu0 %v356_v12  ;;  %v347_v51 = vmul.f32 %v1069_v29, %v1069_v29  ;;  %v434_v5 = vshrl.u32 %v433_v53, 7 }
 0x121   :  { %907 = vmatprep.subr.mxu0 %v939_v28 }
 0x122   :  { %908 = vmatpush3.msra.mxu0 %v355_v46  ;;  %v439_v54 = vsub.s32 0, %v434_v5  ;;  %vm436_vm8 = vcmp.eq.s32.totalorder %v434_v5, 1  ;;  %vm435_vm9 = vcmp.eq.s32.totalorder %v434_v5, 0 }
 0x123   :  { %909 = vmatprep.subr.mxu0 %v939_v28 }
 0x124   :  { %910 = vmatpush3.msra.mxu0 %v354_v49 }
 0x125   :  { %911 = vmatprep.subr.mxu0 %v939_v28 }
 0x126   :  { %912 = vmatpush3.msra.mxu0 %v353_v40 }
 0x127   :  { %913 = vmatprep.subr.mxu0 %v939_v28 }
 0x128   :  { %914 = vmatpush3.msra.mxu0 %v352_v47 }
 0x129   :  { %915 = vmatprep.subr.mxu0 %v939_v28 }
 0x12a   :  { %916 = vmatpush3.msra.mxu0 %v351_v21 }
 0x12b   :  { %917 = vmatprep.subr.mxu0 %v939_v28 }
 0x12c   :  { %918 = vmatpush3.msra.mxu0 %v350_v56 }
 0x12d   :  { %919 = vmatprep.subr.mxu0 %v939_v28 }
 0x12e   :  { %920 = vmatpush3.msra.mxu0 %v349_v44 }
 0x12f   :  { %921 = vmatprep.subr.mxu0 %v939_v28 }
 0x130   :  { %922 = vmatpush3.msra.mxu0 %v348_v1 }
 0x131   :  { %923 = vmatprep.subr.mxu0 %v939_v28 }
 0x132   :  { %924 = vmatpush3.msra.mxu0 %v347_v51 }
 0x133   :  { %926 = vmatmul.mubr.f32.vlgmr.msra.gmra.mxu0 %v941_v45 }
 0x1de   :  { %v343_v33 = vpop.f32.mrf.mxu1 }
 0x1df   :  { %v445_v57 = vrot.slane %v343_v33, %v439_v54 }
 0x1e0   :  { %v892_v50 = vpop.f32.mrf.mxu1 }
 0x1f3   :  { %v429_v58 = vpop.f32.mrf.mxu0 }
 0x1f4   :  { %v440_v39 = vrot.slane %v429_v58, %v439_v54 }
 0x1f5   :  { %v927_v59 = vpop.f32.mrf.mxu0 }
 0x1f6   :  { %v441_v62 = vsel %vm436_vm8, %v440_v39, 0.0 }
 0x1f7   :  { %v446_v52 = vsel %vm435_vm9, %v445_v57, %v441_v62 }
 0x1f8   :  { %447 = vst [vmem:[%s1272_s5] sm:$0xff] %v446_v52 }

// kernel: _forward_impl.2
= control target key start
LH: loop header
LB: loop body
LE: loop exit
PB: predicated region body
PF: predicated region fallthrough
CT: control target
= control target key end

     0   :  { %vm96_vm0 = vcmask 1043456   ;;  %vm71_vm1 = vcmask 64512   ;;  %v694_v10 = vmov 0.0   ;;  %vm695_vm2 = vmmov 0   ;;  %s855_s1 = inlined_call_operand.vmem [shape: bf16[8,128], index: 1, kind: input, shape index: {}]   ;;  %s856_s0 = inlined_call_operand.vmem [shape: bf16[128,8], index: 0, kind: input, shape index: {}]   ;;  %s857_s2 = inlined_call_operand.vmem [shape: bf16[128,128], index: 2, kind: output, shape index: {0}]   ;;  %s858_s3 = inlined_call_operand.vmem [shape: f32[8,128], index: 3, kind: output, shape index: {1}]  }
   0x1   :  { %v30_v0 = vld [vmem:[%s855_s1] sm:$0xf]  ;;  %v687_v3 = vld [vmem:[%s856_s0 + $0x8] sm:$0xff]   ;;  %v688_v4 = vld [vmem:[%s856_s0 + $0x10] sm:$0xff]   ;;  %612 = vmatprep.subr.mxu1 %v694_v10  ;;  %644 = vmatprep.mubr.msk.f32.mxu1 %vm695_vm2, %v694_v10  ;;  %v696_v51 = vmov 1.0   ;;  %v353_v52 = vlaneseq }
   0x2   :  { %682 = vmatprep.subr.msk.bf16.mxu0 %vm96_vm0, %v30_v0  ;;  %v98_v1 = vsel %vm96_vm0, %v30_v0, 0  ;;  %v686_v2 = vld [vmem:[%s856_s0] sm:$0xff]   ;;  %v689_v5 = vld [vmem:[%s856_s0 + $0x18] sm:$0xff]   ;;  %v691_v7 = vld [vmem:[%s856_s0 + $0x28] sm:$0xff]  }
   0x3   :  { %595 = vmatpush3.bf16.msra.mxu0 %v98_v1  ;;  %596 = vmatprep.mubr.msk.bf16.mxu0 %vm71_vm1, %v686_v2  ;;  %v690_v6 = vld [vmem:[%s856_s0 + $0x20] sm:$0xff]   ;;  %v692_v8 = vld [vmem:[%s856_s0 + $0x30] sm:$0xff]   ;;  %v693_v9 = vld [vmem:[%s856_s0 + $0x38] sm:$0xff]   ;;  %v354_v53 = vshrl.u32 %v353_v52, 7 }
   0x4   :  { %647 = vmatprep.subr.mxu0 %v694_v10 }
   0x5   :  { %v359_v54 = vsub.s32 0, %v354_v53  ;;  %vm356_vm3 = vcmp.eq.s32.totalorder %v354_v53, 1  ;;  %vm355_vm4 = vcmp.eq.s32.totalorder %v354_v53, 0 }
   0x6   :  { %597 = vmatmul.mubr.msk.bf16.vlgmr.msra.gmra.mxu0 %vm71_vm1, %v687_v3 }
   0x7   :  { %600 = vmatprep.mubr.msk.bf16.mxu0 %vm71_vm1, %v688_v4 }
   0xe   :  { %601 = vmatmul.mubr.msk.bf16.gmra.mxu0 %vm71_vm1, %v689_v5 }
   0xf   :  { %604 = vmatprep.mubr.msk.bf16.mxu0 %vm71_vm1, %v690_v6 }
  0x16   :  { %605 = vmatmul.mubr.msk.bf16.gmra.mxu0 %vm71_vm1, %v691_v7 }
  0x17   :  { %608 = vmatprep.mubr.msk.bf16.mxu0 %vm71_vm1, %v692_v8 }
  0x1e   :  { %609 = vmatmul.mubr.msk.bf16.gmra.mxu0 %vm71_vm1, %v693_v9 }
  0x1f   :  { %679 = vmatprep.mubr.msk.f32.mxu0 %vm695_vm2, %v694_v10 }
  0xc6   :  { %v756_v11 = vpop.f32.mrf.mxu0 }
  0xc7   :  { %v269_v48 = vmul.f32 %v756_v11, %v756_v11 }
  0xc8   :  { %v758_v12 = vpop.f32.mrf.mxu0 }
  0xc9   :  { %v267_v50 = vmul.f32 %v758_v12, %v758_v12 }
  0xca   :  { %v760_v13 = vpop.f32.mrf.mxu0 }
  0xcb   :  { %v512_v14 = vpack.c.bf16 %v760_v13, %v756_v11  ;;  %v270_v47 = vmul.f32 %v760_v13, %v760_v13 }
  0xcc   :  { %v764_v15 = vpop.f32.mrf.mxu0 }
  0xcd   :  { %544 = vst [vmem:[%s857_s2 + $0x8] sm:$0xff] %v512_v14   ;;  %v507_v16 = vpack.c.bf16 %v764_v15, %v758_v12  ;;  %v268_v49 = vmul.f32 %v764_v15, %v764_v15 }
  0xce   :  { %v771_v17 = vpop.f32.mrf.mxu0 }
  0xcf   :  { %508 = vst [vmem:[%s857_s2] sm:$0xff] %v507_v16   ;;  %v273_v44 = vmul.f32 %v771_v17, %v771_v17 }
  0xd0   :  { %v776_v18 = vpop.f32.mrf.mxu0 }
  0xd1   :  { %v271_v46 = vmul.f32 %v776_v18, %v776_v18 }
  0xd2   :  { %v603_v19 = vpop.f32.mrf.mxu0 }
  0xd3   :  { %v522_v20 = vpack.c.bf16 %v603_v19, %v771_v17  ;;  %v274_v43 = vmul.f32 %v603_v19, %v603_v19 }
  0xd4   :  { %v779_v21 = vpop.f32.mrf.mxu0 }
  0xd5   :  { %546 = vst [vmem:[%s857_s2 + $0x18] sm:$0xff] %v522_v20   ;;  %v517_v22 = vpack.c.bf16 %v779_v21, %v776_v18  ;;  %v272_v45 = vmul.f32 %v779_v21, %v779_v21 }
  0xd6   :  { %v606_v23 = vpop.f32.mrf.mxu0 }
  0xd7   :  { %545 = vst [vmem:[%s857_s2 + $0x10] sm:$0xff] %v517_v22   ;;  %v277_v40 = vmul.f32 %v606_v23, %v606_v23 }
  0xd8   :  { %v166_v24 = vpop.f32.mrf.mxu0 }
  0xd9   :  { %v275_v42 = vmul.f32 %v166_v24, %v166_v24 }
  0xda   :  { %v607_v25 = vpop.f32.mrf.mxu0 }
  0xdb   :  { %v532_v26 = vpack.c.bf16 %v607_v25, %v606_v23  ;;  %v278_v39 = vmul.f32 %v607_v25, %v607_v25 }
  0xdc   :  { %v169_v27 = vpop.f32.mrf.mxu0 }
  0xdd   :  { %548 = vst [vmem:[%s857_s2 + $0x28] sm:$0xff] %v532_v26   ;;  %v527_v28 = vpack.c.bf16 %v169_v27, %v166_v24  ;;  %v276_v41 = vmul.f32 %v169_v27, %v169_v27 }
  0xde   :  { %v610_v29 = vpop.f32.mrf.mxu0 }
  0xdf   :  { %547 = vst [vmem:[%s857_s2 + $0x20] sm:$0xff] %v527_v28   ;;  %v281_v35 = vmul.f32 %v610_v29, %v610_v29 }
  0xe0   :  { %v182_v30 = vpop.f32.mrf.mxu0 }
  0xe1   :  { %v279_v38 = vmul.f32 %v182_v30, %v182_v30 }
  0xe2   :  { %v611_v31 = vpop.f32.mrf.mxu0 }
  0xe3   :  { %v282_v32 = vmul.f32 %v611_v31, %v611_v31  ;;  %v542_v33 = vpack.c.bf16 %v611_v31, %v610_v29  ;;  %613 = vmatpush3.msra.mxu1 %v611_v31 }
  0xe4   :  { %v185_v34 = vpop.f32.mrf.mxu0  ;;  %614 = vmatprep.subr.mxu1 %v694_v10 }
  0xe5   :  { %550 = vst [vmem:[%s857_s2 + $0x38] sm:$0xff] %v542_v33   ;;  %v537_v36 = vpack.c.bf16 %v185_v34, %v182_v30  ;;  %615 = vmatpush3.msra.mxu1 %v610_v29  ;;  %648 = vmatpush3.msra.mxu0 %v282_v32  ;;  %v280_v37 = vmul.f32 %v185_v34, %v185_v34 }
  0xe6   :  { %616 = vmatprep.subr.mxu1 %v694_v10  ;;  %649 = vmatprep.subr.mxu0 %v694_v10 }
  0xe7   :  { %549 = vst [vmem:[%s857_s2 + $0x30] sm:$0xff] %v537_v36   ;;  %617 = vmatpush3.msra.mxu1 %v185_v34  ;;  %650 = vmatpush3.msra.mxu0 %v281_v35 }
  0xe8   :  { %618 = vmatprep.subr.mxu1 %v694_v10  ;;  %651 = vmatprep.subr.mxu0 %v694_v10 }
  0xe9   :  { %619 = vmatpush3.msra.mxu1 %v182_v30  ;;  %652 = vmatpush3.msra.mxu0 %v280_v37 }
  0xea   :  { %620 = vmatprep.subr.mxu1 %v694_v10  ;;  %653 = vmatprep.subr.mxu0 %v694_v10 }
  0xeb   :  { %621 = vmatpush3.msra.mxu1 %v607_v25  ;;  %654 = vmatpush3.msra.mxu0 %v279_v38 }
  0xec   :  { %622 = vmatprep.subr.mxu1 %v694_v10  ;;  %655 = vmatprep.subr.mxu0 %v694_v10 }
  0xed   :  { %623 = vmatpush3.msra.mxu1 %v606_v23  ;;  %656 = vmatpush3.msra.mxu0 %v278_v39 }
  0xee   :  { %624 = vmatprep.subr.mxu1 %v694_v10  ;;  %657 = vmatprep.subr.mxu0 %v694_v10 }
  0xef   :  { %625 = vmatpush3.msra.mxu1 %v169_v27  ;;  %658 = vmatpush3.msra.mxu0 %v277_v40 }
  0xf0   :  { %626 = vmatprep.subr.mxu1 %v694_v10  ;;  %659 = vmatprep.subr.mxu0 %v694_v10 }
  0xf1   :  { %627 = vmatpush3.msra.mxu1 %v166_v24  ;;  %660 = vmatpush3.msra.mxu0 %v276_v41 }
  0xf2   :  { %628 = vmatprep.subr.mxu1 %v694_v10  ;;  %661 = vmatprep.subr.mxu0 %v694_v10 }
  0xf3   :  { %629 = vmatpush3.msra.mxu1 %v603_v19  ;;  %662 = vmatpush3.msra.mxu0 %v275_v42 }
  0xf4   :  { %630 = vmatprep.subr.mxu1 %v694_v10  ;;  %663 = vmatprep.subr.mxu0 %v694_v10 }
  0xf5   :  { %631 = vmatpush3.msra.mxu1 %v771_v17  ;;  %664 = vmatpush3.msra.mxu0 %v274_v43 }
  0xf6   :  { %632 = vmatprep.subr.mxu1 %v694_v10  ;;  %665 = vmatprep.subr.mxu0 %v694_v10 }
  0xf7   :  { %633 = vmatpush3.msra.mxu1 %v779_v21  ;;  %666 = vmatpush3.msra.mxu0 %v273_v44 }
  0xf8   :  { %634 = vmatprep.subr.mxu1 %v694_v10  ;;  %667 = vmatprep.subr.mxu0 %v694_v10 }
  0xf9   :  { %635 = vmatpush3.msra.mxu1 %v776_v18  ;;  %668 = vmatpush3.msra.mxu0 %v272_v45 }
  0xfa   :  { %636 = vmatprep.subr.mxu1 %v694_v10  ;;  %669 = vmatprep.subr.mxu0 %v694_v10 }
  0xfb   :  { %637 = vmatpush3.msra.mxu1 %v760_v13  ;;  %670 = vmatpush3.msra.mxu0 %v271_v46 }
  0xfc   :  { %638 = vmatprep.subr.mxu1 %v694_v10  ;;  %671 = vmatprep.subr.mxu0 %v694_v10 }
  0xfd   :  { %639 = vmatpush3.msra.mxu1 %v756_v11  ;;  %672 = vmatpush3.msra.mxu0 %v270_v47 }
  0xfe   :  { %640 = vmatprep.subr.mxu1 %v694_v10  ;;  %673 = vmatprep.subr.mxu0 %v694_v10 }
  0xff   :  { %641 = vmatpush3.msra.mxu1 %v764_v15  ;;  %674 = vmatpush3.msra.mxu0 %v269_v48 }
 0x100   :  { %642 = vmatprep.subr.mxu1 %v694_v10  ;;  %675 = vmatprep.subr.mxu0 %v694_v10 }
 0x101   :  { %643 = vmatpush3.msra.mxu1 %v758_v12  ;;  %676 = vmatpush3.msra.mxu0 %v268_v49 }
 0x102   :  { %677 = vmatprep.subr.mxu0 %v694_v10  ;;  %645 = vmatmul.mubr.f32.vlgmr.msra.gmra.mxu1 %v696_v51 }
 0x103   :  { %678 = vmatpush3.msra.mxu0 %v267_v50 }
 0x104   :  { %680 = vmatmul.mubr.f32.vlgmr.msra.gmra.mxu0 %v696_v51 }
 0x1c2   :  { %v263_v55 = vpop.f32.mrf.mxu1 }
 0x1c3   :  { %v365_v56 = vrot.slane %v263_v55, %v359_v54 }
 0x1c4   :  { %v349_v57 = vpop.f32.mrf.mxu0  ;;  %v646_v58 = vpop.f32.mrf.mxu1 }
 0x1c5   :  { %v360_v59 = vrot.slane %v349_v57, %v359_v54 }
 0x1c6   :  { %v681_v60 = vpop.f32.mrf.mxu0 }
 0x1c7   :  { %v361_v61 = vsel %vm356_vm3, %v360_v59, 0.0 }
 0x1c8   :  { %v366_v62 = vsel %vm355_vm4, %v365_v56, %v361_v61 }
 0x1c9   :  { %367 = vst [vmem:[%s858_s3] sm:$0xff] %v366_v62 }

</bundles_post_ra>
